<compile_context>
chip_gen: v7x
topology: tpu7x:2x2x1
jax: 0.10.0
libtpu: 0.0.40
codegen_flags: <defaults>
</compile_context>

<pallas_src>
import functools

import jax
import jax.numpy as jnp
import numpy as np
from jax.experimental import pallas as pl
from jax.experimental.pallas import tpu as pltpu

# ---------------- configuration (small, consistent with the module) ----------------
BATCH = 8
MODULE_NUM = 4
TOP_K = MODULE_NUM                      # top_k=None default
MODULE_INPUT = 32                       # module_input_shape
MODULE_HIDDEN = 32                      # module_hidden
GATE_INPUT = 16                         # gate_input_shape
GATE_HIDDENS = (32, 32)                 # gate_hiddens
GATE_OUT = MODULE_NUM * (MODULE_NUM + 1) // 2   # 10
N_GATE_LAYERS = len(GATE_HIDDENS) + 1           # 3


# ---------------------------------- kernel -----------------------------------------
def _depth_route_kernel(mod_in_ref, gate_in_ref, w_ref, b_ref, last_ref, gates_ref, *,
                        module_num, n_gate, gate_in_dim, mod_in_dim):
    f32 = jnp.float32
    M = module_num
    B = mod_in_ref.shape[0]

    def bias(k):
        return b_ref[k:k + 1, :]                       # (1, H), sublane-broadcast add

    # ---------------- gate MLP (relu on all but the last layer) ----------------
    # First layer contracts against only the real gate_input rows of the padded slab.
    g = jnp.dot(gate_in_ref[...], w_ref[0][0:gate_in_dim, :],
                preferred_element_type=f32) + bias(0)
    g = jnp.maximum(g, 0.0)
    for li in range(1, n_gate):
        g = jnp.dot(g, w_ref[li], preferred_element_type=f32) + bias(li)
        if li < n_gate - 1:
            g = jnp.maximum(g, 0.0)
    logits = g                                         # (B, H); only cols < GATE_OUT used

    # ---------------- per-chunk softmax (chunk s has width s+1) ----------------
    # Each chunk uses its OWN max shift, exactly matching the reference and avoiding
    # underflow against padded-zero columns.  Chunk 0 (width 1) is identically 1.
    g_chunks = []
    for s in range(M):
        lo, hi = s * (s + 1) // 2, (s + 1) * (s + 2) // 2
        if s == 0:
            gs = jnp.ones((B, 1), f32)
        else:
            ls = logits[:, lo:hi]                      # (B, s+1) static lane slice
            m = jnp.max(ls, axis=-1, keepdims=True)
            e = jnp.exp(ls - m)
            gs = e / jnp.sum(e, axis=-1, keepdims=True)
        g_chunks.append(gs)
        gates_ref[:, lo:hi] = gs                       # static lane-slice store

    # ---------------- module FC chain with gated residual mixing ----------------
    n_g = n_gate                                       # slab offset of module weights
    out0 = jnp.maximum(
        jnp.dot(mod_in_ref[...], w_ref[n_g][0:mod_in_dim, :],
                preferred_element_type=f32) + bias(n_g), 0.0)
    outs = [out0]
    for i in range(1, M):
        gk = g_chunks[i - 1]                           # (B, i)
        if i == 1:
            fc_in = outs[0]                            # chunk-0 gate is exactly 1
        else:
            fc_in = gk[:, 0:1] * outs[0]
            for j in range(1, i):
                fc_in = fc_in + gk[:, j:j + 1] * outs[j]
        h = jnp.maximum(
            jnp.dot(fc_in, w_ref[n_g + i], preferred_element_type=f32) + bias(n_g + i),
            0.0)
        outs.append(h + fc_in)                         # use_resnet=True
    gk = g_chunks[M - 1]                               # (B, M)
    last = gk[:, 0:1] * outs[0]
    for j in range(1, M):
        last = last + gk[:, j:j + 1] * outs[j]

    last_ref[...] = last


# --------------------------- one-time parameter packing ------------------------------
def pack_params(gate_params, mod_params):
    """Pack all layer weights/biases into two dense slabs.  Runs ONCE at load time."""
    H = MODULE_HIDDEN
    all_params = list(gate_params) + list(mod_params)
    w_slab = np.zeros((len(all_params), H, H), np.float32)
    b_slab = np.zeros((len(all_params), H), np.float32)
    for k, (w, b) in enumerate(all_params):
        w = np.asarray(w, np.float32)
        b = np.asarray(b, np.float32)
        w_slab[k, :w.shape[0], :w.shape[1]] = w
        b_slab[k, :b.shape[0]] = b
    return jnp.asarray(w_slab), jnp.asarray(b_slab)


# --------------------------------- wrapper ------------------------------------------
@jax.jit
def depth_route_forward(module_input, gate_input, w_slab, b_slab):
    # Only the default top_k == module_num path is implemented (static guard).
    assert TOP_K == MODULE_NUM
    B = module_input.shape[0]

    kernel = functools.partial(
        _depth_route_kernel,
        module_num=MODULE_NUM, n_gate=N_GATE_LAYERS,
        gate_in_dim=GATE_INPUT, mod_in_dim=MODULE_INPUT)

    vmem = pl.BlockSpec(memory_space=pltpu.MemorySpace.VMEM)
    last_out, gates = pl.pallas_call(
        kernel,
        out_shape=(jax.ShapeDtypeStruct((B, MODULE_HIDDEN), jnp.float32),
                   jax.ShapeDtypeStruct((B, GATE_OUT), jnp.float32)),
        in_specs=[vmem, vmem, vmem, vmem],
        out_specs=(vmem, vmem),
    )(module_input, gate_input, w_slab, b_slab)

    # Under the default top_k == module_num: softmax_gates == gates, gates_onehot == ones.
    return last_out, gates, jnp.ones_like(gates), gates


# ---------------------------- pure-JAX reference -------------------------------------
def ref_forward(module_input, gate_input, gate_params, mod_params):
    g = gate_input
    for li, (w, b) in enumerate(gate_params):
        g = g @ w + b
        if li < len(gate_params) - 1:
            g = jax.nn.relu(g)
    gates_list, onehot_list, sm_list = [], [], []
    start = 0
    for k in range(1, MODULE_NUM + 1):
        logits = g[:, start:start + k]
        kk = min(TOP_K, k)
        topv, topi = jax.lax.top_k(logits, kk)
        topg = jax.nn.softmax(topv, axis=-1)                  # rescale_prob=True
        oh = jax.nn.one_hot(topi, k, dtype=jnp.float32)       # (B, kk, k)
        gates = jnp.sum(topg[..., None] * oh, axis=-2)        # scatter
        onehot = jnp.sum(oh, axis=-2)
        sm = jax.nn.softmax(logits, axis=-1)
        gates_list.append(gates); onehot_list.append(onehot); sm_list.append(sm)
        start += k
    w0, b0 = mod_params[0]
    out0 = jax.nn.relu(module_input @ w0 + b0)
    outs = [out0]
    for i in range(1, MODULE_NUM):
        gate = gates_list[i - 1]
        stacked = jnp.stack(outs, axis=-2)                    # (B, i, H)
        fc_in = jnp.sum(stacked * gate[..., None], axis=-2)
        w, b = mod_params[i]
        fc_out = jax.nn.relu(fc_in @ w + b) + fc_in           # use_resnet=True
        outs.append(fc_out)
    stacked = jnp.stack(outs, axis=-2)
    last = jnp.sum(stacked * gates_list[-1][..., None], axis=-2)
    return (last,
            jnp.concatenate(gates_list, -1),
            jnp.concatenate(onehot_list, -1),
            jnp.concatenate(sm_list, -1))


# ------------------------------------ main -------------------------------------------
def _linear_init(key, fan_in, fan_out):
    kw, kb = jax.random.split(key)
    bound = 1.0 / np.sqrt(fan_in)
    w = jax.random.uniform(kw, (fan_in, fan_out), jnp.float32, -bound, bound)
    b = jax.random.uniform(kb, (fan_out,), jnp.float32, -bound, bound)
    return w, b


if __name__ == "__main__":
    key = jax.random.PRNGKey(0)
    keys = jax.random.split(key, 16)

    module_input = jax.random.normal(keys[0], (BATCH, MODULE_INPUT), jnp.float32)
    gate_input = jax.random.normal(keys[1], (BATCH, GATE_INPUT), jnp.float32)

    # gate MLP params: GATE_INPUT -> GATE_HIDDENS... -> GATE_OUT
    gate_params = []
    ki = 2
    fan_in = GATE_INPUT
    for h in list(GATE_HIDDENS) + [GATE_OUT]:
        gate_params.append(_linear_init(keys[ki], fan_in, h))
        fan_in = h
        ki += 1

    # module FC params: MODULE_INPUT -> H, then (H -> H) x (MODULE_NUM - 1)
    mod_params = [_linear_init(keys[ki], MODULE_INPUT, MODULE_HIDDEN)]
    ki += 1
    for _ in range(MODULE_NUM - 1):
        mod_params.append(_linear_init(keys[ki], MODULE_HIDDEN, MODULE_HIDDEN))
        ki += 1

    # One-time slab packing (parameters are static in eval — NOT in the per-call path).
    w_slab, b_slab = pack_params(gate_params, mod_params)

    outs = depth_route_forward(module_input, gate_input, w_slab, b_slab)
    outs = jax.block_until_ready(outs)

    refs = ref_forward(module_input, gate_input, gate_params, mod_params)
    names = ["last_out", "gates", "gates_onehot", "softmax_gates"]
    for name, got, want in zip(names, outs, refs):
        np.testing.assert_allclose(np.asarray(got), np.asarray(want),
                                   rtol=1e-5, atol=1e-5, err_msg=name)

    print("KERNEL_OK")
</pallas_src>

<mosaic_0001>
module attributes {stable_mosaic.version = 11 : i64} {
  func.func @_depth_route_kernel(%arg0: memref<8x32xf32, #tpu.memory_space<vmem>>, %arg1: memref<8x16xf32, #tpu.memory_space<vmem>>, %arg2: memref<7x32x32xf32, #tpu.memory_space<vmem>>, %arg3: memref<7x32xf32, #tpu.memory_space<vmem>>, %arg4: memref<8x32xf32, #tpu.memory_space<vmem>>, %arg5: memref<8x10xf32, #tpu.memory_space<vmem>>) attributes {dimension_semantics = [], scalar_prefetch = 0 : i64, scratch_operands = 0 : i64, tpu.core_type = #tpu.core_type<tc>} {
    %c0 = arith.constant 0 : index
    %c0_0 = arith.constant 0 : index
    %0 = vector.load %arg1[%c0, %c0_0] : memref<8x16xf32, #tpu.memory_space<vmem>>, vector<8x16xf32>
    %c0_1 = arith.constant 0 : index
    %c0_2 = arith.constant 0 : index
    %c0_3 = arith.constant 0 : index
    %1 = vector.load %arg2[%c0_1, %c0_2, %c0_3] : memref<7x32x32xf32, #tpu.memory_space<vmem>>, vector<1x32x32xf32>
    %2 = vector.shape_cast %1 : vector<1x32x32xf32> to vector<32x32xf32>
    %3 = vector.extract_strided_slice %2 {offsets = [0, 0], sizes = [16, 32], strides = [1, 1]} : vector<32x32xf32> to vector<16x32xf32>
    %cst = arith.constant dense<0.000000e+00> : vector<8x32xf32>
    %4 = tpu.matmul %0, %3, %cst {dimension_numbers = #tpu.dot_dimension_numbers<[1], [0], [0], [1], [0, 0, 1, 1], [], []>} : vector<8x16xf32>, vector<16x32xf32>, vector<8x32xf32> -> vector<8x32xf32>
    %c0_4 = arith.constant 0 : index
    %c0_5 = arith.constant 0 : index
    %5 = vector.load %arg3[%c0_4, %c0_5] : memref<7x32xf32, #tpu.memory_space<vmem>>, vector<1x32xf32>
    %6 = vector.broadcast %5 : vector<1x32xf32> to vector<8x32xf32>
    %7 = arith.addf %4, %6 : vector<8x32xf32>
    %cst_6 = arith.constant 0.000000e+00 : f32
    %8 = vector.broadcast %cst_6 : f32 to vector<8x32xf32>
    %9 = arith.maximumf %7, %8 : vector<8x32xf32>
    %c1 = arith.constant 1 : index
    %c0_7 = arith.constant 0 : index
    %c0_8 = arith.constant 0 : index
    %10 = vector.load %arg2[%c1, %c0_7, %c0_8] : memref<7x32x32xf32, #tpu.memory_space<vmem>>, vector<1x32x32xf32>
    %11 = vector.shape_cast %10 : vector<1x32x32xf32> to vector<32x32xf32>
    %cst_9 = arith.constant dense<0.000000e+00> : vector<8x32xf32>
    %12 = tpu.matmul %9, %11, %cst_9 {dimension_numbers = #tpu.dot_dimension_numbers<[1], [0], [0], [1], [0, 0, 1, 1], [], []>} : vector<8x32xf32>, vector<32x32xf32>, vector<8x32xf32> -> vector<8x32xf32>
    %c1_10 = arith.constant 1 : index
    %c0_11 = arith.constant 0 : index
    %13 = vector.load %arg3[%c1_10, %c0_11] : memref<7x32xf32, #tpu.memory_space<vmem>>, vector<1x32xf32>
    %14 = vector.broadcast %13 : vector<1x32xf32> to vector<8x32xf32>
    %15 = arith.addf %12, %14 : vector<8x32xf32>
    %cst_12 = arith.constant 0.000000e+00 : f32
    %16 = vector.broadcast %cst_12 : f32 to vector<8x32xf32>
    %17 = arith.maximumf %15, %16 : vector<8x32xf32>
    %c2 = arith.constant 2 : index
    %c0_13 = arith.constant 0 : index
    %c0_14 = arith.constant 0 : index
    %18 = vector.load %arg2[%c2, %c0_13, %c0_14] : memref<7x32x32xf32, #tpu.memory_space<vmem>>, vector<1x32x32xf32>
    %19 = vector.shape_cast %18 : vector<1x32x32xf32> to vector<32x32xf32>
    %cst_15 = arith.constant dense<0.000000e+00> : vector<8x32xf32>
    %20 = tpu.matmul %17, %19, %cst_15 {dimension_numbers = #tpu.dot_dimension_numbers<[1], [0], [0], [1], [0, 0, 1, 1], [], []>} : vector<8x32xf32>, vector<32x32xf32>, vector<8x32xf32> -> vector<8x32xf32>
    %c2_16 = arith.constant 2 : index
    %c0_17 = arith.constant 0 : index
    %21 = vector.load %arg3[%c2_16, %c0_17] : memref<7x32xf32, #tpu.memory_space<vmem>>, vector<1x32xf32>
    %22 = vector.broadcast %21 : vector<1x32xf32> to vector<8x32xf32>
    %23 = arith.addf %20, %22 : vector<8x32xf32>
    %cst_18 = arith.constant 1.000000e+00 : f32
    %24 = vector.broadcast %cst_18 : f32 to vector<8x1xf32>
    %c0_19 = arith.constant 0 : index
    %c0_20 = arith.constant 0 : index
    %25 = vector.load %arg5[%c0_19, %c0_20] : memref<8x10xf32, #tpu.memory_space<vmem>>, vector<8x1xf32>
    tpu.vector_store %arg5[%c0_19, %c0_20], %24 {strides = array<i32>} : memref<8x10xf32, #tpu.memory_space<vmem>>, vector<8x1xf32>,
    %26 = vector.extract_strided_slice %23 {offsets = [0, 1], sizes = [8, 2], strides = [1, 1]} : vector<8x32xf32> to vector<8x2xf32>
    %cst_21 = arith.constant dense<0xFF800000> : vector<8xf32>
    %27 = vector.multi_reduction <maximumf>, %26, %cst_21 [1] : vector<8x2xf32> to vector<8xf32>
    %28 = vector.shape_cast %27 : vector<8xf32> to vector<8x1xf32>
    %29 = vector.broadcast %28 : vector<8x1xf32> to vector<8x2xf32>
    %30 = arith.subf %26, %29 : vector<8x2xf32>
    %31 = math.exp %30 : vector<8x2xf32>
    %cst_22 = arith.constant dense<0.000000e+00> : vector<8xf32>
    %32 = vector.multi_reduction <add>, %31, %cst_22 [1] : vector<8x2xf32> to vector<8xf32>
    %33 = vector.shape_cast %32 : vector<8xf32> to vector<8x1xf32>
    %34 = vector.broadcast %33 : vector<8x1xf32> to vector<8x2xf32>
    %35 = arith.divf %31, %34 : vector<8x2xf32>
    %c0_23 = arith.constant 0 : index
    %c1_24 = arith.constant 1 : index
    %36 = vector.load %arg5[%c0_23, %c1_24] : memref<8x10xf32, #tpu.memory_space<vmem>>, vector<8x2xf32>
    tpu.vector_store %arg5[%c0_23, %c1_24], %35 {strides = array<i32>} : memref<8x10xf32, #tpu.memory_space<vmem>>, vector<8x2xf32>,
    %37 = vector.extract_strided_slice %23 {offsets = [0, 3], sizes = [8, 3], strides = [1, 1]} : vector<8x32xf32> to vector<8x3xf32>
    %cst_25 = arith.constant dense<0xFF800000> : vector<8xf32>
    %38 = vector.multi_reduction <maximumf>, %37, %cst_25 [1] : vector<8x3xf32> to vector<8xf32>
    %39 = vector.shape_cast %38 : vector<8xf32> to vector<8x1xf32>
    %40 = vector.broadcast %39 : vector<8x1xf32> to vector<8x3xf32>
    %41 = arith.subf %37, %40 : vector<8x3xf32>
    %42 = math.exp %41 : vector<8x3xf32>
    %cst_26 = arith.constant dense<0.000000e+00> : vector<8xf32>
    %43 = vector.multi_reduction <add>, %42, %cst_26 [1] : vector<8x3xf32> to vector<8xf32>
    %44 = vector.shape_cast %43 : vector<8xf32> to vector<8x1xf32>
    %45 = vector.broadcast %44 : vector<8x1xf32> to vector<8x3xf32>
    %46 = arith.divf %42, %45 : vector<8x3xf32>
    %c0_27 = arith.constant 0 : index
    %c3 = arith.constant 3 : index
    %47 = vector.load %arg5[%c0_27, %c3] : memref<8x10xf32, #tpu.memory_space<vmem>>, vector<8x3xf32>
    tpu.vector_store %arg5[%c0_27, %c3], %46 {strides = array<i32>} : memref<8x10xf32, #tpu.memory_space<vmem>>, vector<8x3xf32>,
    %48 = vector.extract_strided_slice %23 {offsets = [0, 6], sizes = [8, 4], strides = [1, 1]} : vector<8x32xf32> to vector<8x4xf32>
    %cst_28 = arith.constant dense<0xFF800000> : vector<8xf32>
    %49 = vector.multi_reduction <maximumf>, %48, %cst_28 [1] : vector<8x4xf32> to vector<8xf32>
    %50 = vector.shape_cast %49 : vector<8xf32> to vector<8x1xf32>
    %51 = vector.broadcast %50 : vector<8x1xf32> to vector<8x4xf32>
    %52 = arith.subf %48, %51 : vector<8x4xf32>
    %53 = math.exp %52 : vector<8x4xf32>
    %cst_29 = arith.constant dense<0.000000e+00> : vector<8xf32>
    %54 = vector.multi_reduction <add>, %53, %cst_29 [1] : vector<8x4xf32> to vector<8xf32>
    %55 = vector.shape_cast %54 : vector<8xf32> to vector<8x1xf32>
    %56 = vector.broadcast %55 : vector<8x1xf32> to vector<8x4xf32>
    %57 = arith.divf %53, %56 : vector<8x4xf32>
    %c0_30 = arith.constant 0 : index
    %c6 = arith.constant 6 : index
    %58 = vector.load %arg5[%c0_30, %c6] : memref<8x10xf32, #tpu.memory_space<vmem>>, vector<8x4xf32>
    tpu.vector_store %arg5[%c0_30, %c6], %57 {strides = array<i32>} : memref<8x10xf32, #tpu.memory_space<vmem>>, vector<8x4xf32>,
    %c0_31 = arith.constant 0 : index
    %c0_32 = arith.constant 0 : index
    %59 = vector.load %arg0[%c0_31, %c0_32] : memref<8x32xf32, #tpu.memory_space<vmem>>, vector<8x32xf32>
    %c3_33 = arith.constant 3 : index
    %c0_34 = arith.constant 0 : index
    %c0_35 = arith.constant 0 : index
    %60 = vector.load %arg2[%c3_33, %c0_34, %c0_35] : memref<7x32x32xf32, #tpu.memory_space<vmem>>, vector<1x32x32xf32>
    %61 = vector.shape_cast %60 : vector<1x32x32xf32> to vector<32x32xf32>
    %cst_36 = arith.constant dense<0.000000e+00> : vector<8x32xf32>
    %62 = tpu.matmul %59, %61, %cst_36 {dimension_numbers = #tpu.dot_dimension_numbers<[1], [0], [0], [1], [0, 0, 1, 1], [], []>} : vector<8x32xf32>, vector<32x32xf32>, vector<8x32xf32> -> vector<8x32xf32>
    %c3_37 = arith.constant 3 : index
    %c0_38 = arith.constant 0 : index
    %63 = vector.load %arg3[%c3_37, %c0_38] : memref<7x32xf32, #tpu.memory_space<vmem>>, vector<1x32xf32>
    %64 = vector.broadcast %63 : vector<1x32xf32> to vector<8x32xf32>
    %65 = arith.addf %62, %64 : vector<8x32xf32>
    %cst_39 = arith.constant 0.000000e+00 : f32
    %66 = vector.broadcast %cst_39 : f32 to vector<8x32xf32>
    %67 = arith.maximumf %65, %66 : vector<8x32xf32>
    %c4 = arith.constant 4 : index
    %c0_40 = arith.constant 0 : index
    %c0_41 = arith.constant 0 : index
    %68 = vector.load %arg2[%c4, %c0_40, %c0_41] : memref<7x32x32xf32, #tpu.memory_space<vmem>>, vector<1x32x32xf32>
    %69 = vector.shape_cast %68 : vector<1x32x32xf32> to vector<32x32xf32>
    %cst_42 = arith.constant dense<0.000000e+00> : vector<8x32xf32>
    %70 = tpu.matmul %67, %69, %cst_42 {dimension_numbers = #tpu.dot_dimension_numbers<[1], [0], [0], [1], [0, 0, 1, 1], [], []>} : vector<8x32xf32>, vector<32x32xf32>, vector<8x32xf32> -> vector<8x32xf32>
    %c4_43 = arith.constant 4 : index
    %c0_44 = arith.constant 0 : index
    %71 = vector.load %arg3[%c4_43, %c0_44] : memref<7x32xf32, #tpu.memory_space<vmem>>, vector<1x32xf32>
    %72 = vector.broadcast %71 : vector<1x32xf32> to vector<8x32xf32>
    %73 = arith.addf %70, %72 : vector<8x32xf32>
    %cst_45 = arith.constant 0.000000e+00 : f32
    %74 = vector.broadcast %cst_45 : f32 to vector<8x32xf32>
    %75 = arith.maximumf %73, %74 : vector<8x32xf32>
    %76 = arith.addf %75, %67 : vector<8x32xf32>
    %77 = vector.extract_strided_slice %35 {offsets = [0, 0], sizes = [8, 1], strides = [1, 1]} : vector<8x2xf32> to vector<8x1xf32>
    %78 = vector.broadcast %77 : vector<8x1xf32> to vector<8x32xf32>
    %79 = arith.mulf %78, %67 : vector<8x32xf32>
    %80 = vector.extract_strided_slice %35 {offsets = [0, 1], sizes = [8, 1], strides = [1, 1]} : vector<8x2xf32> to vector<8x1xf32>
    %81 = vector.broadcast %80 : vector<8x1xf32> to vector<8x32xf32>
    %82 = arith.mulf %81, %76 : vector<8x32xf32>
    %83 = arith.addf %79, %82 : vector<8x32xf32>
    %c5 = arith.constant 5 : index
    %c0_46 = arith.constant 0 : index
    %c0_47 = arith.constant 0 : index
    %84 = vector.load %arg2[%c5, %c0_46, %c0_47] : memref<7x32x32xf32, #tpu.memory_space<vmem>>, vector<1x32x32xf32>
    %85 = vector.shape_cast %84 : vector<1x32x32xf32> to vector<32x32xf32>
    %cst_48 = arith.constant dense<0.000000e+00> : vector<8x32xf32>
    %86 = tpu.matmul %83, %85, %cst_48 {dimension_numbers = #tpu.dot_dimension_numbers<[1], [0], [0], [1], [0, 0, 1, 1], [], []>} : vector<8x32xf32>, vector<32x32xf32>, vector<8x32xf32> -> vector<8x32xf32>
    %c5_49 = arith.constant 5 : index
    %c0_50 = arith.constant 0 : index
    %87 = vector.load %arg3[%c5_49, %c0_50] : memref<7x32xf32, #tpu.memory_space<vmem>>, vector<1x32xf32>
    %88 = vector.broadcast %87 : vector<1x32xf32> to vector<8x32xf32>
    %89 = arith.addf %86, %88 : vector<8x32xf32>
    %cst_51 = arith.constant 0.000000e+00 : f32
    %90 = vector.broadcast %cst_51 : f32 to vector<8x32xf32>
    %91 = arith.maximumf %89, %90 : vector<8x32xf32>
    %92 = arith.addf %91, %83 : vector<8x32xf32>
    %93 = vector.extract_strided_slice %46 {offsets = [0, 0], sizes = [8, 1], strides = [1, 1]} : vector<8x3xf32> to vector<8x1xf32>
    %94 = vector.broadcast %93 : vector<8x1xf32> to vector<8x32xf32>
    %95 = arith.mulf %94, %67 : vector<8x32xf32>
    %96 = vector.extract_strided_slice %46 {offsets = [0, 1], sizes = [8, 1], strides = [1, 1]} : vector<8x3xf32> to vector<8x1xf32>
    %97 = vector.broadcast %96 : vector<8x1xf32> to vector<8x32xf32>
    %98 = arith.mulf %97, %76 : vector<8x32xf32>
    %99 = arith.addf %95, %98 : vector<8x32xf32>
    %100 = vector.extract_strided_slice %46 {offsets = [0, 2], sizes = [8, 1], strides = [1, 1]} : vector<8x3xf32> to vector<8x1xf32>
    %101 = vector.broadcast %100 : vector<8x1xf32> to vector<8x32xf32>
    %102 = arith.mulf %101, %92 : vector<8x32xf32>
    %103 = arith.addf %99, %102 : vector<8x32xf32>
    %c6_52 = arith.constant 6 : index
    %c0_53 = arith.constant 0 : index
    %c0_54 = arith.constant 0 : index
    %104 = vector.load %arg2[%c6_52, %c0_53, %c0_54] : memref<7x32x32xf32, #tpu.memory_space<vmem>>, vector<1x32x32xf32>
    %105 = vector.shape_cast %104 : vector<1x32x32xf32> to vector<32x32xf32>
    %cst_55 = arith.constant dense<0.000000e+00> : vector<8x32xf32>
    %106 = tpu.matmul %103, %105, %cst_55 {dimension_numbers = #tpu.dot_dimension_numbers<[1], [0], [0], [1], [0, 0, 1, 1], [], []>} : vector<8x32xf32>, vector<32x32xf32>, vector<8x32xf32> -> vector<8x32xf32>
    %c6_56 = arith.constant 6 : index
    %c0_57 = arith.constant 0 : index
    %107 = vector.load %arg3[%c6_56, %c0_57] : memref<7x32xf32, #tpu.memory_space<vmem>>, vector<1x32xf32>
    %108 = vector.broadcast %107 : vector<1x32xf32> to vector<8x32xf32>
    %109 = arith.addf %106, %108 : vector<8x32xf32>
    %cst_58 = arith.constant 0.000000e+00 : f32
    %110 = vector.broadcast %cst_58 : f32 to vector<8x32xf32>
    %111 = arith.maximumf %109, %110 : vector<8x32xf32>
    %112 = arith.addf %111, %103 : vector<8x32xf32>
    %113 = vector.extract_strided_slice %57 {offsets = [0, 0], sizes = [8, 1], strides = [1, 1]} : vector<8x4xf32> to vector<8x1xf32>
    %114 = vector.broadcast %113 : vector<8x1xf32> to vector<8x32xf32>
    %115 = arith.mulf %114, %67 : vector<8x32xf32>
    %116 = vector.extract_strided_slice %57 {offsets = [0, 1], sizes = [8, 1], strides = [1, 1]} : vector<8x4xf32> to vector<8x1xf32>
    %117 = vector.broadcast %116 : vector<8x1xf32> to vector<8x32xf32>
    %118 = arith.mulf %117, %76 : vector<8x32xf32>
    %119 = arith.addf %115, %118 : vector<8x32xf32>
    %120 = vector.extract_strided_slice %57 {offsets = [0, 2], sizes = [8, 1], strides = [1, 1]} : vector<8x4xf32> to vector<8x1xf32>
    %121 = vector.broadcast %120 : vector<8x1xf32> to vector<8x32xf32>
    %122 = arith.mulf %121, %92 : vector<8x32xf32>
    %123 = arith.addf %119, %122 : vector<8x32xf32>
    %124 = vector.extract_strided_slice %57 {offsets = [0, 3], sizes = [8, 1], strides = [1, 1]} : vector<8x4xf32> to vector<8x1xf32>
    %125 = vector.broadcast %124 : vector<8x1xf32> to vector<8x32xf32>
    %126 = arith.mulf %125, %112 : vector<8x32xf32>
    %127 = arith.addf %123, %126 : vector<8x32xf32>
    %c0_59 = arith.constant 0 : index
    %c0_60 = arith.constant 0 : index
    %128 = vector.load %arg4[%c0_59, %c0_60] : memref<8x32xf32, #tpu.memory_space<vmem>>, vector<8x32xf32>
    tpu.vector_store %arg4[%c0_59, %c0_60], %127 {strides = array<i32>} : memref<8x32xf32, #tpu.memory_space<vmem>>, vector<8x32xf32>,
    return
  }
}

</mosaic_0001>

<bundles_post_ra>
// kernel: depth_route_forward.1
= control target key start
LH: loop header
LB: loop body
LE: loop exit
PB: predicated region body
PF: predicated region fallthrough
CT: control target
= control target key end

     0   :  { %11 = vsyncpa [#allocation3], 0  ;;  %s1269_s0 = inlined_call_operand.hbm [shape: f32[8,32], index: 0, kind: input, shape index: {}]   ;;  %s1270_s1 = inlined_call_operand.hbm [shape: f32[8,16], index: 1, kind: input, shape index: {}]   ;;  %s1271_s2 = inlined_call_operand.hbm [shape: f32[7,32,32], index: 2, kind: input, shape index: {}]   ;;  %s1272_s3 = inlined_call_operand.vmem [shape: f32[7,32], index: 3, kind: input, shape index: {}]   ;;  %s1273_s4 = inlined_call_operand.hbm [shape: f32[8,32], index: 4, kind: output, shape index: {0}]   ;;  %s1274_s5 = inlined_call_operand.vmem [shape: f32[8,10], index: 5, kind: output, shape index: {1}]  }
   0x1   :  { %12 = vsyncpa [#allocation6], 0 }
   0x2   :  { %13 = vsyncpa [#allocation4], 0  ;;  %s1076_s18 = smov [#allocation5]   ;;  %s1077_s20 = smov [#allocation2]  }
   0x3   :  { %s30_s19 = sshll.u32 %s1076_s18, 4  ;;  %s20_s21 = sshll.u32 %s1077_s20, 4  ;;  %s31_s19 = int_to_ptr.vmem [resolvable:$true] %s30_s19  ;;  %s21_s21 = int_to_ptr.vmem [resolvable:$true] %s20_s21 }
   0x4   :  { %s982_s24 = scalar_lea.hbm %s1270_s1, 128 }
   0x5   :  { %p983_p0 = scmp.ne.s32.totalorder %s1270_s1, %s982_s24  ;;  %p986_p1 = scmp.lt.u32.totalorder %s982_s24, %s1270_s1 }
   0x7   :  { %p988_p2 = pnand %p986_p1, %p983_p0 }
   0x9   :  { %991 = shalt.err (!%p988_p2)
}
   0xa   :  { %s992_s29 = scalar_lea.vmem %s31_s19, 128  ;;  %p997_p4 = scmp.lt.s32.totalorder %s31_s19, %s31_s19 }
   0xb   :  { %p993_p3 = scmp.ne.s32.totalorder %s31_s19, %s992_s29  ;;  %p998_p5 = scmp.lt.s32.totalorder %s992_s29, %s992_s29 }
   0xd   :  { %p999_p6 = por %p998_p5, %p997_p4 }
   0xf   :  { %p1000_p7 = pnand %p999_p6, %p993_p3 }
  0x11   :  { %1003 = shalt.err (!%p1000_p7)
}
  0x12   :  { %33 = dma.hbm_to_vmem [thread:$0]  %s1270_s1, 128, %s31_s19, [#allocation6]  }
  0x13   :  { %s1004_s9 = scalar_lea.hbm %s1269_s0, 128 }
  0x14   :  { %p1005_p8 = scmp.ne.s32.totalorder %s1269_s0, %s1004_s9  ;;  %p1008_p9 = scmp.lt.u32.totalorder %s1004_s9, %s1269_s0 }
  0x16   :  { %p1010_p10 = pnand %p1008_p9, %p1005_p8 }
  0x18   :  { %1013 = shalt.err (!%p1010_p10)
}
  0x19   :  { %s1014_s14 = scalar_lea.vmem %s21_s21, 128  ;;  %p1019_p12 = scmp.lt.s32.totalorder %s21_s21, %s21_s21 }
  0x1a   :  { %p1015_p11 = scmp.ne.s32.totalorder %s21_s21, %s1014_s14  ;;  %p1020_p13 = scmp.lt.s32.totalorder %s1014_s14, %s1014_s14 }
  0x1c   :  { %p1021_p0 = por %p1020_p13, %p1019_p12 }
  0x1e   :  { %p1022_p1 = pnand %p1021_p0, %p1015_p11 }
  0x20   :  { %1025 = shalt.err (!%p1022_p1)
}
  0x21   :  { %23 = dma.hbm_to_vmem [thread:$0]  %s1269_s0, 128, %s21_s21, [#allocation3]  }
  0x22   :  { %s1078_s16 = smov [#allocation7]   ;;  %s1026_s20 = scalar_lea.hbm %s1271_s2, 3584 }
  0x23   :  { %s39_s17 = sshll.u32 %s1078_s16, 4  ;;  %p1027_p2 = scmp.ne.s32.totalorder %s1271_s2, %s1026_s20  ;;  %s40_s17 = int_to_ptr.vmem [resolvable:$true] %s39_s17 }
  0x24   :  { %p1030_p3 = scmp.lt.u32.totalorder %s1026_s20, %s1271_s2 }
  0x26   :  { %p1032_p4 = pnand %p1030_p3, %p1027_p2 }
  0x28   :  { %1035 = shalt.err (!%p1032_p4)
}
  0x29   :  { %s1036_s26 = scalar_lea.vmem %s40_s17, 3584  ;;  %p1041_p6 = scmp.lt.s32.totalorder %s40_s17, %s40_s17 }
  0x2a   :  { %p1037_p5 = scmp.ne.s32.totalorder %s40_s17, %s1036_s26  ;;  %p1042_p7 = scmp.lt.s32.totalorder %s1036_s26, %s1036_s26 }
  0x2c   :  { %p1043_p8 = por %p1042_p7, %p1041_p6 }
  0x2e   :  { %p1044_p9 = pnand %p1043_p8, %p1037_p5 }
  0x30   :  { %1047 = shalt.err (!%p1044_p9)
}
  0x31   :  { %s1079_s0 = smov 128   ;;  %s1080_s21 = smov 8  }
  0x32   :  { %45 = dma.hbm_to_vmem [thread:$0]  %s1271_s2, 3584, %s40_s17, [#allocation6], %s1079_s0, %s1079_s0, %s1080_s21  }
  0x33   :  { %1070 = dma.done.wait [#allocation3], 128  }
  0x34   :  { %1071 = vsyncadd [#allocation3], 4294967168 }
  0x35   :  { %1072 = dma.done.wait [#allocation6], 3712  }
  0x36   :  { %1073 = vsyncadd [#allocation6], 4294963584  ;;  %v1081_v0 = vmov 0.0|0.0   ;;  %vm1082_vm0 = vmmov 0   ;;  %v1083_v1 = vmov 0.0   ;;  %v58_v2 = vld [vmem:[#allocation7] sm:$0xff] }
  0x37   :  { %899 = vmatprep.subr.bf16.mxu0 %v1081_v0  ;;  %830 = vmatprep.mubr.msk.f32.mxu0 %vm1082_vm0, %v1083_v1  ;;  %v59_v3 = vld [vmem:[#allocation7 + $0x8] sm:$0xff]  ;;  %v141_v5 = vld [vmem:[#allocation7 + $0x20] sm:$0xff]  ;;  %v57_v8 = vld [vmem:[#allocation5] sm:$0xff]  ;;  %vm65_vm1 = vcmask 130048   ;;  %vm150_vm2 = vcmask 261120   ;;  %vm310_vm3 = vcmask 23560  }
  0x38   :  { %902 = vmatprep.subr.bf16.mxu1 %v1081_v0  ;;  %841 = vmatprep.mubr.msk.f32.mxu1 %vm1082_vm0, %v1083_v1  ;;  %v900_v4 = vpack.c.bf16 %v59_v3, %v58_v2  ;;  %v142_v6 = vld [vmem:[#allocation7 + $0x28] sm:$0xff]  ;;  %v143_v9 = vld [vmem:[#allocation7 + $0x30] sm:$0xff]  ;;  %v144_v10 = vld [vmem:[#allocation7 + $0x38] sm:$0xff]  ;;  %s1084_s11 = smov 127   ;;  %vm321_vm4 = vcmask 15360   ;;  %vm328_vm5 = vcmask 48152  }
  0x39   :  { %v903_v7 = vpack.c.bf16 %v142_v6, %v141_v5  ;;  %v906_v11 = vpack.c.bf16 %v144_v10, %v143_v9  ;;  %v226_v12 = vld [vmem:[#allocation7 + $0x40] sm:$0xff]  ;;  %v227_v13 = vld [vmem:[#allocation7 + $0x48] sm:$0xff]  ;;  %v779_v15 = vld [vmem:[%s1272_s3] ss:$0 sm:$0xff]  ;;  %vm308_vm6 = vcmask 7168   ;;  %v1085_v58 = vmov 1  }
  0x3a   :  { %901 = vmatpush3.bf16.msra.mxu0 %v900_v4  ;;  %v909_v14 = vpack.c.bf16 %v227_v13, %v226_v12  ;;  %v228_v20 = vld [vmem:[#allocation7 + $0x50] sm:$0xff]  ;;  %v229_v21 = vld [vmem:[#allocation7 + $0x58] sm:$0xff]  ;;  %v366_v28 = vld [vmem:[#allocation7 + $0x60] sm:$0xff]  ;;  %960 = vset.pattern.permute.xlu1 %v1085_v58  ;;  %v1086_v59 = vmov 1.0   ;;  %v1087_v10 = vmov 2   ;;  %s1088_s15 = smov 125  }
  0x3b   :  { %904 = vmatpush3.bf16.msra.mxu1 %v903_v7  ;;  %908 = vmatprep.subr.bf16.mxu0 %v1081_v0  ;;  %v912_v22 = vpack.c.bf16 %v229_v21, %v228_v20  ;;  %v781_v23 = vld [vmem:[%s1272_s3 + $0x1] ss:$0 sm:$0xff]  ;;  %v367_v29 = vld [vmem:[#allocation7 + $0x68] sm:$0xff]  ;;  %v369_v32 = vld [vmem:[#allocation7 + $0x78] sm:$0xff]  ;;  %309 = vst.msk [vmem:[%s1274_s5] sm:$0xff] %vm308_vm6, %v1086_v59  ;;  %vm346_vm7 = vcmask 80944  }
  0x3c   :  { %905 = vmatprep.subr.bf16.mxu1 %v1081_v0  ;;  %v368_v30 = vld [vmem:[#allocation7 + $0x70] sm:$0xff]  ;;  %v915_v31 = vpack.c.bf16 %v367_v29, %v366_v28  ;;  %v450_v40 = vld [vmem:[#allocation7 + $0x80] sm:$0xff]  ;;  %v451_v41 = vld [vmem:[#allocation7 + $0x88] sm:$0xff]  ;;  %vm339_vm8 = vcmask 23552   ;;  %s1092_s20 = smov 122   ;;  %vm357_vm9 = vcmask 31744  }
  0x3d   :  { %831 = vmatmul.mubr.msk.f32.vlgmr.msra.gmra.mrb[0].mxu0 %vm65_vm1, %v57_v8  ;;  %v918_v33 = vpack.c.bf16 %v369_v32, %v368_v30  ;;  %v364_v34 = vld [vmem:[#allocation2] sm:$0xff]  ;;  %v921_v42 = vpack.c.bf16 %v451_v41, %v450_v40  ;;  %v453_v44 = vld [vmem:[#allocation7 + $0x98] sm:$0xff]  ;;  %v547_v5 = vld [vmem:[#allocation7 + $0xa0] sm:$0xff]  ;;  %v1094_v58 = vmov 6  }
  0x3e   :  { %852 = vmatprep.mubr.msk.f32.mxu0 %vm1082_vm0, %v1083_v1  ;;  %910 = vmatpush3.bf16.msra.mxu0 %v909_v14  ;;  %v783_v35 = vld [vmem:[%s1272_s3 + $0x2] ss:$0 sm:$0xff]  ;;  %v785_v46 = vld [vmem:[%s1272_s3 + $0x3] ss:$0 sm:$0xff]  ;;  %v548_v6 = vld [vmem:[#allocation7 + $0xa8] sm:$0xff] }
  0x3f   :  { %907 = vmatpush3.bf16.msra.mxu1 %v906_v11  ;;  %911 = vmatprep.subr.bf16.mxu0 %v1081_v0  ;;  %v452_v43 = vld [vmem:[#allocation7 + $0x90] sm:$0xff]  ;;  %v927_v7 = vpack.c.bf16 %v548_v6, %v547_v5  ;;  %v550_v9 = vld [vmem:[#allocation7 + $0xb8] sm:$0xff] }
  0x40   :  { %914 = vmatprep.subr.bf16.mxu1 %v1081_v0  ;;  %v924_v45 = vpack.c.bf16 %v453_v44, %v452_v43  ;;  %v549_v8 = vld [vmem:[#allocation7 + $0xb0] sm:$0xff] }
  0x41   :  { %v930_v11 = vpack.c.bf16 %v550_v9, %v549_v8  ;;  %v787_v14 = vld [vmem:[%s1272_s3 + $0x4] ss:$0 sm:$0xff]  ;;  %v789_v43 = vld [vmem:[%s1272_s3 + $0x5] ss:$0 sm:$0xff] }
  0x42   :  { %913 = vmatpush3.bf16.msra.mxu0 %v912_v22 }
  0x43   :  { %920 = vmatprep.subr.bf16.mxu0 %v1081_v0 }
 0x110   :  { %v135_v16 = vpop.f32.mrb[0].mxu0 }
 0x111   :  { %v136_v17 = vadd.f32 %v779_v15, %v135_v16  ;;  %v832_v18 = vpop.f32.mrb[1].mxu0 }
 0x113   :  { %v139_v19 = vmax.f32 %v136_v17, 0.0 }
 0x115   :  { %842 = vmatmul.mubr.msk.f32.vlgmr.msra.gmra.mrb[0].mxu1 %vm150_vm2, %v139_v19 }
 0x116   :  { %863 = vmatprep.mubr.msk.f32.mxu1 %vm1082_vm0, %v1083_v1  ;;  %916 = vmatpush3.bf16.msra.mxu1 %v915_v31 }
 0x117   :  { %917 = vmatprep.subr.bf16.mxu1 %v1081_v0 }
 0x11a   :  { %919 = vmatpush3.bf16.msra.mxu1 %v918_v33  ;;  %v650_v33 = vld [vmem:[#allocation7 + $0xc0] sm:$0xff] }
 0x11b   :  { %926 = vmatprep.subr.bf16.mxu1 %v1081_v0 }
 0x11d   :  { %864 = vmatmul.mubr.msk.f32.vlgmr.msra.gmra.mrb[2].mxu1 %vm150_vm2, %v364_v34  ;;  %v651_v34 = vld [vmem:[#allocation7 + $0xc8] sm:$0xff] }
 0x11e   :  { %885 = vmatprep.mubr.msk.f32.mxu1 %vm1082_vm0, %v1083_v1  ;;  %928 = vmatpush3.bf16.msra.mxu1 %v927_v7 }
 0x11f   :  { %929 = vmatprep.subr.bf16.mxu1 %v1081_v0 }
 0x122   :  { %931 = vmatpush3.bf16.msra.mxu1 %v930_v11 }
 0x1e8   :  { %v220_v24 = vpop.f32.mrb[0].mxu1 }
 0x1e9   :  { %v221_v25 = vadd.f32 %v781_v23, %v220_v24  ;;  %v843_v26 = vpop.f32.mrb[1].mxu1 }
 0x1ea   :  { %v1090_v26 = vmov 4  }
 0x1eb   :  { %v224_v27 = vmax.f32 %v221_v25, 0.0  ;;  %v1089_v25 = vmov 3  }
 0x1ec   :  { %962 = vset.pattern.permute.xlu0 %v1089_v25 }
 0x1ed   :  { %853 = vmatmul.mubr.msk.f32.vlgmr.msra.gmra.mrb[2].mxu0 %vm150_vm2, %v224_v27 }
 0x1ee   :  { %874 = vmatprep.mubr.msk.f32.mxu0 %vm1082_vm0, %v1083_v1  ;;  %922 = vmatpush3.bf16.msra.mxu0 %v921_v42 }
 0x1ef   :  { %923 = vmatprep.subr.bf16.mxu0 %v1081_v0 }
 0x1f0   :  { %v444_v47 = vpop.f32.mrb[2].mxu1 }
 0x1f1   :  { %v445_v48 = vadd.f32 %v785_v46, %v444_v47  ;;  %v865_v49 = vpop.f32.mrb[3].mxu1 }
 0x1f2   :  { %925 = vmatpush3.bf16.msra.mxu0 %v924_v45 }
 0x1f3   :  { %932 = vmatprep.subr.bf16.mxu0 %v1081_v0  ;;  %v1206_v50 = vmax.f32 %v445_v48, 0.0 }
 0x1f5   :  { %875 = vmatmul.mubr.msk.f32.vlgmr.msra.gmra.mrb[4].mxu0 %vm150_vm2, %v1206_v50 }
 0x1f6   :  { %896 = vmatprep.mubr.msk.f32.mxu0 %vm1082_vm0, %v1083_v1 }
 0x2c0   :  { %v304_v36 = vpop.f32.mrb[2].mxu0 }
 0x2c1   :  { %v1197_v37 = vadd.f32 %v783_v35, %v304_v36  ;;  %v854_v38 = vpop.f32.mrb[3].mxu0  ;;  %v933_v35 = vpack.c.bf16 %v651_v34, %v650_v33  ;;  %v652_v36 = vld [vmem:[#allocation7 + $0xd0] sm:$0xff] }
 0x2c2   :  { %v653_v38 = vld [vmem:[#allocation7 + $0xd8] sm:$0xff] }
 0x2c3   :  { %v311_v39 = vsel %vm310_vm3, %v1197_v37, -inf  ;;  %v329_v57 = vsel %vm328_vm5, %v1197_v37, -inf  ;;  %v347_v13 = vsel %vm346_vm7, %v1197_v37, -inf  ;;  %934 = vmatpush3.bf16.msra.mxu0 %v933_v35 }
 0x2c4   :  { %312 = vmax.xlane.f32.xlu0 %v311_v39  ;;  %935 = vmatprep.subr.bf16.mxu0 %v1081_v0  ;;  %v936_v39 = vpack.c.bf16 %v653_v38, %v652_v36 }
 0x2c7   :  { %937 = vmatpush3.bf16.msra.mxu0 %v936_v39 }
 0x2c8   :  { %v528_v60 = vpop.f32.mrb[4].mxu0 }
 0x2c9   :  { %v876_v61 = vpop.f32.mrb[5].mxu0  ;;  %v529_v17 = vadd.f32 %v787_v14, %v528_v60 }
 0x2cb   :  { %v532_v18 = vmax.f32 %v529_v17, 0.0 }
 0x2cd   :  { %v1230_v20 = vadd.f32 %v532_v18, %v1206_v50 }
 0x351   :  { %v313_v51 = vpop.xlane.xlu0 %312 }
 0x352   :  { %v314_v52 = vsub.f32 %v1197_v37, %v313_v51 }
 0x354   :  { %v315_v53 = vmul.f32 1.442695, %v314_v52 }
 0x356   :  { %970 = vpow2.f32 %v315_v53 }
 0x360   :  { %v971_v54 = vpop.eup %970 }
 0x361   :  { %318 = vrot.lane.b32.xlu0 %v971_v54, %s1084_s11 }
 0x3d3   :  { %v319_v55 = vpop.permute.xlu0 %318 }
 0x3d4   :  { %v322_v56 = vsel %vm321_vm4, %v319_v55, 0.0 }
 0x3d5   :  { %323 = vadd.xlane.f32.xlu1 %v322_v56 }
 0x3d9   :  { %330 = vmax.xlane.f32.xlu1 %v329_v57  ;;  %v1093_v57 = vmov 9  }
 0x462   :  { %v324_v62 = vpop.xlane.xlu1 %323 }
 0x463   :  { %972 = vrcp.f32 %v324_v62  ;;  %v1095_v62 = vmov 7  }
 0x466   :  { %v331_v63 = vpop.xlane.xlu1 %330 }
 0x467   :  { %v332_v1 = vsub.f32 %v1197_v37, %v331_v63  ;;  %v1096_v63 = vmov 8  }
 0x469   :  { %v333_v2 = vmul.f32 1.442695, %v332_v1 }
 0x46b   :  { %974 = vpow2.f32 %v333_v2 }
 0x46d   :  { %v973_v3 = vpop.eup %972 }
 0x46e   :  { %v326_v4 = vmul.f32 %v973_v3, %v971_v54  ;;  %v791_v3 = vld [vmem:[%s1272_s3 + $0x6] ss:$0 sm:$0xff] }
 0x470   :  { %536 = vperm.xlu1 %960, %v326_v4   ;;  %327 = vst.msk [vmem:[%s1274_s5] sm:$0xff] %vm310_vm3, %v326_v4 }
 0x474   :  { %961 = vset.pattern.permute.xlu1 %v1087_v10 }
 0x475   :  { %v975_v12 = vpop.eup %974  ;;  %541 = vperm.xlu1 %961, %v326_v4  }
 0x476   :  { %336 = vrot.lane.b32.xlu0 %v975_v12, %s1088_s15 }
 0x479   :  { %963 = vset.pattern.permute.xlu1 %v1090_v26 }
 0x495   :  { %348 = vmax.xlane.f32.xlu0 %v347_v13 }
 0x4e8   :  { %v337_v15 = vpop.permute.xlu0 %336 }
 0x4e9   :  { %v340_v16 = vsel %vm339_vm8, %v337_v15, 0.0 }
 0x4ea   :  { %341 = vadd.xlane.f32.xlu1 %v340_v16 }
 0x4ef   :  { %v537_v19 = vpop.permute.xlu1 %536 }
 0x4f0   :  { %v539_v22 = vmul.f32 %v537_v19, %v1206_v50 }
 0x4f4   :  { %v542_v21 = vpop.permute.xlu1 %541 }
 0x4f5   :  { %v544_v23 = vmul.f32 %v542_v21, %v1230_v20 }
 0x4f7   :  { %v545_v24 = vadd.f32 %v544_v23, %v539_v22 }
 0x4f9   :  { %886 = vmatmul.mubr.msk.f32.vlgmr.msra.gmra.mrb[4].mxu1 %vm150_vm2, %v545_v24 }
 0x522   :  { %v349_v28 = vpop.xlane.xlu0 %348 }
 0x523   :  { %v350_v29 = vsub.f32 %v1197_v37, %v349_v28  ;;  %v1091_v37 = vmov 5  }
 0x525   :  { %v351_v30 = vmul.f32 1.442695, %v350_v29 }
 0x577   :  { %v342_v27 = vpop.xlane.xlu1 %341 }
 0x578   :  { %976 = vrcp.f32 %v342_v27 }
 0x579   :  { %978 = vpow2.f32 %v351_v30 }
 0x582   :  { %v977_v31 = vpop.eup %976 }
 0x583   :  { %v344_v32 = vmul.f32 %v977_v31, %v975_v12  ;;  %v979_v40 = vpop.eup %978 }
 0x585   :  { %638 = vperm.xlu1 %963, %v344_v32   ;;  %345 = vst.msk [vmem:[%s1274_s5] sm:$0xff] %vm328_vm5, %v344_v32  ;;  %633 = vperm.xlu0 %962, %v344_v32  }
 0x589   :  { %964 = vset.pattern.permute.xlu1 %v1091_v37  ;;  %965 = vset.pattern.permute.xlu0 %v1094_v58 }
 0x58a   :  { %644 = vperm.xlu1 %964, %v344_v32  }
 0x58e   :  { %354 = vrot.lane.b32.xlu1 %v979_v40, %s1092_s20 }
 0x58f   :  { %968 = vset.pattern.permute.xlu1 %v1093_v57 }
 0x5cc   :  { %v625_v41 = vpop.f32.mrb[4].mxu1 }
 0x5cd   :  { %v887_v42 = vpop.f32.mrb[5].mxu1  ;;  %v626_v44 = vadd.f32 %v789_v43, %v625_v41 }
 0x5cf   :  { %v629_v45 = vmax.f32 %v626_v44, 0.0 }
 0x5d1   :  { %v630_v49 = vadd.f32 %v629_v45, %v545_v24 }
 0x604   :  { %v639_v46 = vpop.permute.xlu1 %638  ;;  %v634_v0 = vpop.permute.xlu0 %633 }
 0x605   :  { %v641_v47 = vmul.f32 %v639_v46, %v1230_v20  ;;  %v636_v48 = vmul.f32 %v634_v0, %v1206_v50 }
 0x607   :  { %v642_v52 = vadd.f32 %v641_v47, %v636_v48 }
 0x609   :  { %v645_v51 = vpop.permute.xlu1 %644 }
 0x60a   :  { %v647_v53 = vmul.f32 %v645_v51, %v630_v49 }
 0x60c   :  { %v648_v54 = vadd.f32 %v647_v53, %v642_v52 }
 0x60d   :  { %v355_v55 = vpop.permute.xlu1 %354 }
 0x60e   :  { %897 = vmatmul.mubr.msk.f32.vlgmr.msra.gmra.mrb[6].mxu0 %vm150_vm2, %v648_v54  ;;  %v358_v56 = vsel %vm357_vm9, %v355_v55, 0.0 }
 0x60f   :  { %359 = vadd.xlane.f32.xlu1 %v358_v56 }
 0x69c   :  { %v360_v59 = vpop.xlane.xlu1 %359 }
 0x69d   :  { %980 = vrcp.f32 %v360_v59 }
 0x6a7   :  { %v981_v60 = vpop.eup %980 }
 0x6a8   :  { %v362_v61 = vmul.f32 %v981_v60, %v979_v40 }
 0x6aa   :  { %363 = vst.msk [vmem:[%s1274_s5] sm:$0xff] %vm346_vm7, %v362_v61  ;;  %753 = vperm.xlu1 %968, %v362_v61   ;;  %736 = vperm.xlu0 %965, %v362_v61   ;;  %s1097_s5 = smov [#allocation8]  }
 0x6ab   :  { %s765_s21 = sshll.u32 %s1097_s5, 4  ;;  %s766_s21 = int_to_ptr.vmem [resolvable:$true] %s765_s21 }
 0x6ac   :  { %s1048_s3 = scalar_lea.vmem %s766_s21, 128  ;;  %p1053_p11 = scmp.lt.s32.totalorder %s766_s21, %s766_s21 }
 0x6ad   :  { %p1049_p10 = scmp.ne.s32.totalorder %s766_s21, %s1048_s3  ;;  %p1054_p12 = scmp.lt.s32.totalorder %s1048_s3, %s1048_s3 }
 0x6ae   :  { %966 = vset.pattern.permute.xlu0 %v1095_v62 }
 0x6af   :  { %741 = vperm.xlu0 %966, %v362_v61   ;;  %p1055_p13 = por %p1054_p12, %p1053_p11 }
 0x6b1   :  { %p1056_p0 = pnand %p1055_p13, %p1049_p10 }
 0x6b3   :  { %967 = vset.pattern.permute.xlu0 %v1096_v63 }
 0x6b4   :  { %747 = vperm.xlu0 %967, %v362_v61  }
 0x6b8   :  { %969 = vset.pattern.permute.xlu0 %v1093_v57 }
 0x6e1   :  { %v728_v1 = vpop.f32.mrb[6].mxu0 }
 0x6e2   :  { %v898_v2 = vpop.f32.mrb[7].mxu0  ;;  %v729_v5 = vadd.f32 %v791_v3, %v728_v1 }
 0x6e4   :  { %v732_v7 = vmax.f32 %v729_v5, 0.0 }
 0x6e6   :  { %v733_v12 = vadd.f32 %v732_v7, %v648_v54 }
 0x729   :  { %v737_v4 = vpop.permute.xlu0 %736  ;;  %v754_v10 = vpop.permute.xlu1 %753 }
 0x72a   :  { %v739_v9 = vmul.f32 %v737_v4, %v1206_v50  ;;  %v756_v15 = vmul.f32 %v754_v10, %v733_v12 }
 0x72e   :  { %v742_v6 = vpop.permute.xlu0 %741 }
 0x72f   :  { %v744_v8 = vmul.f32 %v742_v6, %v1230_v20 }
 0x731   :  { %v745_v13 = vadd.f32 %v744_v8, %v739_v9 }
 0x733   :  { %v748_v11 = vpop.permute.xlu0 %747 }
 0x734   :  { %v750_v14 = vmul.f32 %v748_v11, %v630_v49 }
 0x736   :  { %v751_v16 = vadd.f32 %v750_v14, %v745_v13 }
 0x738   :  { %v757_v17 = vadd.f32 %v756_v15, %v751_v16 }
 0x73a   :  { %758 = vst.msk [vmem:[#allocation8] sm:$0xff] %vm150_vm2, %v757_v17 }
 0x73b   :  { %1059 = shalt.err (!%p1056_p0)
}
 0x73c   :  { %s1060_s2 = scalar_lea.hbm %s1273_s4, 128 }
 0x73d   :  { %p1061_p1 = scmp.ne.s32.totalorder %s1273_s4, %s1060_s2  ;;  %p1064_p2 = scmp.lt.u32.totalorder %s1060_s2, %s1273_s4 }
 0x73f   :  { %p1066_p3 = pnand %p1064_p2, %p1061_p1 }
 0x741   :  { %1069 = shalt.err (!%p1066_p3)
}
 0x742   :  { %768 = dma.vmem_to_hbm [thread:$0]  %s766_s21, 128, %s1273_s4, [#allocation4]  }
 0x743   :  { %1074 = dma.done.wait [#allocation4], 128  }
 0x744   :  { %1075 = vsyncadd [#allocation4], 4294967168 }
 0x745   :  { %776 = vsyncpa [#allocation3], 1 }
 0x746   :  { %777 = vsyncpa [#allocation6], 1 }
 0x747   :  { %778 = vsyncpa [#allocation4], 1 }

</bundles_post_ra>
